<compile_context>
chip_gen: v7x
topology: tpu7x:2x2x1
jax: 0.10.0
libtpu: 0.0.40
codegen_flags: <defaults>
</compile_context>

<pallas_src>
import jax
import jax.numpy as jnp
from jax.experimental import pallas as pl
from jax.experimental.pallas import tpu as pltpu

LANE = 128
SUBLANE = 8
MAX_TILE_B = 1024      # cap on rows per grid step (tunable; sweep if needed)
SMALL_B = 512          # at or below this, single-tile fast path
NEG = -1e30            # finite "minus infinity" for padded action columns


def _round_up(x, m):
    return ((x + m - 1) // m) * m


def actor_kernel(x_ref, w1_ref, b1_ref, w2_ref, b2_ref, w3_ref, b3_ref, o_ref):
    # x arrives f32; cast to bf16 in-kernel (MXU-native operand dtype).
    x = x_ref[...].astype(jnp.bfloat16)
    # --- fc1 + ReLU (K = input_dims, unpadded; f32 MXU accumulation) ---
    h1 = jnp.dot(x, w1_ref[...], preferred_element_type=jnp.float32)
    h1 = jnp.maximum(h1 + b1_ref[...], 0.0)
    # --- fc2 + ReLU ---
    h2 = jnp.dot(h1.astype(jnp.bfloat16), w2_ref[...],
                 preferred_element_type=jnp.float32)
    h2 = jnp.maximum(h2 + b2_ref[...], 0.0)
    # --- fc3 (logits). Padded action columns: w3 col = 0, bias = NEG -> prob 0.
    logits = jnp.dot(h2.astype(jnp.bfloat16), w3_ref[...],
                     preferred_element_type=jnp.float32) + b3_ref[...]
    # --- numerically-stable softmax over the (padded) action axis.
    # max/sum hit the XLU, exp/reciprocal the EUP -> off the MXU/VALU path.
    m = jnp.max(logits, axis=-1, keepdims=True)
    e = jnp.exp(logits - m)
    denom = jnp.sum(e, axis=-1, keepdims=True)
    # NOTE: approx=True normalizes to ~1e-4; use approx=False if downstream
    # Categorical log_prob needs exact normalization.
    o_ref[...] = (e * pl.reciprocal(denom, approx=True)).astype(o_ref.dtype)


def prepare_params(params, n_actions):
    """One-time: cast matmul weights to bf16; pad ONLY the action (N) dim."""
    w1, b1 = params["w1"], params["b1"]
    w2, b2 = params["w2"], params["b2"]
    w3, b3 = params["w3"], params["b3"]
    n_pad = _round_up(n_actions, LANE)

    w3p = jnp.zeros((w3.shape[0], n_pad), jnp.bfloat16)
    w3p = w3p.at[:, :n_actions].set(w3.astype(jnp.bfloat16))
    b3p = jnp.full((1, n_pad), NEG, jnp.float32)
    b3p = b3p.at[:, :n_actions].set(b3.astype(jnp.float32))

    return {
        "w1": w1.astype(jnp.bfloat16), "b1": b1.astype(jnp.float32),
        "w2": w2.astype(jnp.bfloat16), "b2": b2.astype(jnp.float32),
        "w3": w3p, "b3": b3p,
        "n_pad": n_pad, "input_dims": int(w1.shape[0]), "n_actions": n_actions,
    }


def _choose_tiling(B, max_tile_b=MAX_TILE_B):
    """Returns (tile_b, b_pad). Small B -> one tile; large B -> even #tiles."""
    if B <= SMALL_B:
        tile_b = max(_round_up(B, SUBLANE), SUBLANE)
        return tile_b, tile_b
    n_tiles = _round_up(pl.cdiv(B, max_tile_b), 2)   # even grid -> 2 TCs on v7x
    tile_b = _round_up(pl.cdiv(B, n_tiles), SUBLANE)
    return tile_b, tile_b * n_tiles


def actor_forward(state, prepped, *, max_tile_b=MAX_TILE_B):
    """state: (B, input_dims) f32. Returns (B, n_actions) f32 probabilities."""
    B, input_dims = state.shape
    assert input_dims == prepped["input_dims"]
    n_pad, n_actions = prepped["n_pad"], prepped["n_actions"]
    fc1 = prepped["w1"].shape[1]
    fc2 = prepped["w2"].shape[1]

    tile_b, b_pad = _choose_tiling(B, max_tile_b)
    x = state if b_pad == B else jnp.pad(state, ((0, b_pad - B), (0, 0)))
    grid = (b_pad // tile_b,)
    const = lambda i: (0, 0)   # weights/biases: same block -> VMEM-resident

    weight_bytes = (input_dims * fc1 + fc1 * fc2 + fc2 * n_pad) * 2 \
                   + (fc1 + fc2 + n_pad) * 4
    cost = pl.CostEstimate(
        flops=2 * b_pad * (input_dims * fc1 + fc1 * fc2 + fc2 * n_pad),
        transcendentals=b_pad * n_pad,
        bytes_accessed=b_pad * (input_dims * 4 + n_pad * 4) + weight_bytes,
    )

    out = pl.pallas_call(
        actor_kernel,
        out_shape=jax.ShapeDtypeStruct((b_pad, n_pad), jnp.float32),
        grid=grid,
        in_specs=[
            pl.BlockSpec((tile_b, input_dims), lambda i: (i, 0)),  # x: f32 stream
            pl.BlockSpec((input_dims, fc1), const),                # w1 (unpadded K)
            pl.BlockSpec((1, fc1), const),                         # b1
            pl.BlockSpec((fc1, fc2), const),                       # w2
            pl.BlockSpec((1, fc2), const),                         # b2
            pl.BlockSpec((fc2, n_pad), const),                     # w3 (pad cols = 0)
            pl.BlockSpec((1, n_pad), const),                       # b3 (pad cols = NEG)
        ],
        out_specs=pl.BlockSpec((tile_b, n_pad), lambda i: (i, 0)), # lane-dense out
        compiler_params=pltpu.CompilerParams(
            dimension_semantics=("parallel",)),   # shards batch tiles on v7x
        cost_estimate=cost,
    )(x, prepped["w1"], prepped["b1"], prepped["w2"], prepped["b2"],
      prepped["w3"], prepped["b3"])

    return out[:B, :n_actions]


def init_params(key, input_dims, fc1_dims, fc2_dims, n_actions):
    """Deterministic init mimicking PyTorch nn.Linear default: U(+-1/sqrt(fan_in))."""
    ks = jax.random.split(key, 6)

    def linear(kw, kb, fan_in, fan_out):
        bound = 1.0 / jnp.sqrt(jnp.float32(fan_in))
        w = jax.random.uniform(kw, (fan_in, fan_out), jnp.float32, -bound, bound)
        b = jax.random.uniform(kb, (1, fan_out), jnp.float32, -bound, bound)
        return w, b

    w1, b1 = linear(ks[0], ks[1], input_dims, fc1_dims)
    w2, b2 = linear(ks[2], ks[3], fc1_dims, fc2_dims)
    w3, b3 = linear(ks[4], ks[5], fc2_dims, n_actions)
    return {"w1": w1, "b1": b1, "w2": w2, "b2": b2, "w3": w3, "b3": b3}


if __name__ == "__main__":
    # Shapes consistent with the module: input_dims=(32,), fc1=fc2=256, n_actions=8.
    input_dims, fc1_dims, fc2_dims, n_actions = 32, 256, 256, 8

    key = jax.random.PRNGKey(0)
    k_params, k_small, k_big = jax.random.split(key, 3)
    params = init_params(k_params, input_dims, fc1_dims, fc2_dims, n_actions)
    prepped = prepare_params(params, n_actions)

    def jax_ref(x):
        xb = x.astype(jnp.bfloat16)
        w1b = params["w1"].astype(jnp.bfloat16)
        w2b = params["w2"].astype(jnp.bfloat16)
        w3b = params["w3"].astype(jnp.bfloat16)
        h1 = jnp.maximum(jnp.dot(xb, w1b, preferred_element_type=jnp.float32)
                         + params["b1"], 0.0)
        h2 = jnp.maximum(jnp.dot(h1.astype(jnp.bfloat16), w2b,
                                 preferred_element_type=jnp.float32)
                         + params["b2"], 0.0)
        logits = jnp.dot(h2.astype(jnp.bfloat16), w3b,
                         preferred_element_type=jnp.float32) + params["b3"]
        return jax.nn.softmax(logits, axis=-1)

    # batch=64 -> single-tile fast path (grid=(1,), 64 rows, no 128-row pad).
    # batch=1200 -> even grid=(2,) of 600-row tiles (exercises multi-tile path).
    for batch, k in ((64, k_small), (1200, k_big)):
        state = jax.random.normal(k, (batch, input_dims), jnp.float32)
        probs = jax.block_until_ready(actor_forward(state, prepped))
        assert probs.shape == (batch, n_actions)
        ref = jax_ref(state)
        assert jnp.allclose(probs, ref, atol=5e-3, rtol=5e-3), \
            f"mismatch vs JAX reference at batch={batch}"
        assert jnp.allclose(jnp.sum(probs, axis=-1), 1.0, atol=5e-3)

    # TODO(synk): Categorical() sampling / log_prob, Adam optimizer and checkpoint
    # I/O are host/training-side and not part of the forward kernel.
    print("KERNEL_OK")
</pallas_src>

<mosaic_0001>
module attributes {stable_mosaic.version = 11 : i64} {
  func.func @actor_kernel(%arg0: i32, %arg1: memref<64x32xf32, #tpu.memory_space<vmem>>, %arg2: memref<32x256xbf16, #tpu.memory_space<vmem>>, %arg3: memref<1x256xf32, #tpu.memory_space<vmem>>, %arg4: memref<256x256xbf16, #tpu.memory_space<vmem>>, %arg5: memref<1x256xf32, #tpu.memory_space<vmem>>, %arg6: memref<256x128xbf16, #tpu.memory_space<vmem>>, %arg7: memref<1x128xf32, #tpu.memory_space<vmem>>, %arg8: memref<64x128xf32, #tpu.memory_space<vmem>>) attributes {dimension_semantics = [#tpu.dimension_semantics<parallel>], iteration_bounds = array<i64: 1>, scalar_prefetch = 0 : i64, scratch_operands = 0 : i64, tpu.core_type = #tpu.core_type<tc>, window_params = [{transform_indices = @transform_0, window_bounds = array<i64: 64, 32>}, {pipeline_mode = #tpu.pipeline_mode<synchronous>, transform_indices = @transform_1, window_bounds = array<i64: 32, 256>}, {pipeline_mode = #tpu.pipeline_mode<synchronous>, transform_indices = @transform_2, window_bounds = array<i64: 1, 256>}, {pipeline_mode = #tpu.pipeline_mode<synchronous>, transform_indices = @transform_3, window_bounds = array<i64: 256, 256>}, {pipeline_mode = #tpu.pipeline_mode<synchronous>, transform_indices = @transform_4, window_bounds = array<i64: 1, 256>}, {pipeline_mode = #tpu.pipeline_mode<synchronous>, transform_indices = @transform_5, window_bounds = array<i64: 256, 128>}, {pipeline_mode = #tpu.pipeline_mode<synchronous>, transform_indices = @transform_6, window_bounds = array<i64: 1, 128>}, {transform_indices = @transform_7, window_bounds = array<i64: 64, 128>}]} {
    %c0 = arith.constant 0 : index
    %c0_0 = arith.constant 0 : index
    %0 = vector.load %arg1[%c0, %c0_0] : memref<64x32xf32, #tpu.memory_space<vmem>>, vector<64x32xf32>
    %1 = arith.truncf %0 : vector<64x32xf32> to vector<64x32xbf16>
    %c0_1 = arith.constant 0 : index
    %c0_2 = arith.constant 0 : index
    %2 = vector.load %arg2[%c0_1, %c0_2] : memref<32x256xbf16, #tpu.memory_space<vmem>>, vector<32x256xbf16>
    %cst = arith.constant dense<0.000000e+00> : vector<64x256xf32>
    %3 = tpu.matmul %1, %2, %cst {dimension_numbers = #tpu.dot_dimension_numbers<[1], [0], [0], [1], [0, 0, 1, 1], [], []>} : vector<64x32xbf16>, vector<32x256xbf16>, vector<64x256xf32> -> vector<64x256xf32>
    %c0_3 = arith.constant 0 : index
    %c0_4 = arith.constant 0 : index
    %4 = vector.load %arg3[%c0_3, %c0_4] : memref<1x256xf32, #tpu.memory_space<vmem>>, vector<1x256xf32>
    %5 = vector.broadcast %4 : vector<1x256xf32> to vector<64x256xf32>
    %6 = arith.addf %3, %5 : vector<64x256xf32>
    %cst_5 = arith.constant 0.000000e+00 : f32
    %7 = vector.broadcast %cst_5 : f32 to vector<64x256xf32>
    %8 = arith.maximumf %6, %7 : vector<64x256xf32>
    %9 = arith.truncf %8 : vector<64x256xf32> to vector<64x256xbf16>
    %c0_6 = arith.constant 0 : index
    %c0_7 = arith.constant 0 : index
    %10 = vector.load %arg4[%c0_6, %c0_7] : memref<256x256xbf16, #tpu.memory_space<vmem>>, vector<256x256xbf16>
    %cst_8 = arith.constant dense<0.000000e+00> : vector<64x256xf32>
    %11 = tpu.matmul %9, %10, %cst_8 {dimension_numbers = #tpu.dot_dimension_numbers<[1], [0], [0], [1], [0, 0, 1, 1], [], []>} : vector<64x256xbf16>, vector<256x256xbf16>, vector<64x256xf32> -> vector<64x256xf32>
    %c0_9 = arith.constant 0 : index
    %c0_10 = arith.constant 0 : index
    %12 = vector.load %arg5[%c0_9, %c0_10] : memref<1x256xf32, #tpu.memory_space<vmem>>, vector<1x256xf32>
    %13 = vector.broadcast %12 : vector<1x256xf32> to vector<64x256xf32>
    %14 = arith.addf %11, %13 : vector<64x256xf32>
    %cst_11 = arith.constant 0.000000e+00 : f32
    %15 = vector.broadcast %cst_11 : f32 to vector<64x256xf32>
    %16 = arith.maximumf %14, %15 : vector<64x256xf32>
    %17 = arith.truncf %16 : vector<64x256xf32> to vector<64x256xbf16>
    %c0_12 = arith.constant 0 : index
    %c0_13 = arith.constant 0 : index
    %18 = vector.load %arg6[%c0_12, %c0_13] : memref<256x128xbf16, #tpu.memory_space<vmem>>, vector<256x128xbf16>
    %cst_14 = arith.constant dense<0.000000e+00> : vector<64x128xf32>
    %19 = tpu.matmul %17, %18, %cst_14 {dimension_numbers = #tpu.dot_dimension_numbers<[1], [0], [0], [1], [0, 0, 1, 1], [], []>} : vector<64x256xbf16>, vector<256x128xbf16>, vector<64x128xf32> -> vector<64x128xf32>
    %c0_15 = arith.constant 0 : index
    %c0_16 = arith.constant 0 : index
    %20 = vector.load %arg7[%c0_15, %c0_16] : memref<1x128xf32, #tpu.memory_space<vmem>>, vector<1x128xf32>
    %21 = vector.broadcast %20 : vector<1x128xf32> to vector<64x128xf32>
    %22 = arith.addf %19, %21 : vector<64x128xf32>
    %cst_17 = arith.constant dense<0xFF800000> : vector<64xf32>
    %23 = vector.multi_reduction <maximumf>, %22, %cst_17 [1] : vector<64x128xf32> to vector<64xf32>
    %24 = vector.shape_cast %23 : vector<64xf32> to vector<64x1xf32>
    %25 = vector.broadcast %24 : vector<64x1xf32> to vector<64x128xf32>
    %26 = arith.subf %22, %25 : vector<64x128xf32>
    %27 = math.exp %26 : vector<64x128xf32>
    %cst_18 = arith.constant dense<0.000000e+00> : vector<64xf32>
    %28 = vector.multi_reduction <add>, %27, %cst_18 [1] : vector<64x128xf32> to vector<64xf32>
    %29 = vector.shape_cast %28 : vector<64xf32> to vector<64x1xf32>
    %30 = tpu.reciprocal %29 {approx = true} : vector<64x1xf32> -> vector<64x1xf32>
    %31 = vector.broadcast %30 : vector<64x1xf32> to vector<64x128xf32>
    %32 = arith.mulf %27, %31 : vector<64x128xf32>
    %c0_19 = arith.constant 0 : index
    %c0_20 = arith.constant 0 : index
    %33 = vector.load %arg8[%c0_19, %c0_20] : memref<64x128xf32, #tpu.memory_space<vmem>>, vector<64x128xf32>
    tpu.vector_store %arg8[%c0_19, %c0_20], %32 {strides = array<i32>} : memref<64x128xf32, #tpu.memory_space<vmem>>, vector<64x128xf32>,
    return
  }
  func.func @transform_0(%arg0: i32) -> (i32, i32) {
    %c0_i32 = arith.constant 0 : i32
    %c0_i32_0 = arith.constant 0 : i32
    return %arg0, %c0_i32 : i32, i32
  }
  func.func @transform_1(%arg0: i32) -> (i32, i32) {
    %c0_i32 = arith.constant 0 : i32
    %c0_i32_0 = arith.constant 0 : i32
    %c0_i32_1 = arith.constant 0 : i32
    return %c0_i32, %c0_i32_0 : i32, i32
  }
  func.func @transform_2(%arg0: i32) -> (i32, i32) {
    %c0_i32 = arith.constant 0 : i32
    %c0_i32_0 = arith.constant 0 : i32
    %c0_i32_1 = arith.constant 0 : i32
    return %c0_i32, %c0_i32_0 : i32, i32
  }
  func.func @transform_3(%arg0: i32) -> (i32, i32) {
    %c0_i32 = arith.constant 0 : i32
    %c0_i32_0 = arith.constant 0 : i32
    %c0_i32_1 = arith.constant 0 : i32
    return %c0_i32, %c0_i32_0 : i32, i32
  }
  func.func @transform_4(%arg0: i32) -> (i32, i32) {
    %c0_i32 = arith.constant 0 : i32
    %c0_i32_0 = arith.constant 0 : i32
    %c0_i32_1 = arith.constant 0 : i32
    return %c0_i32, %c0_i32_0 : i32, i32
  }
  func.func @transform_5(%arg0: i32) -> (i32, i32) {
    %c0_i32 = arith.constant 0 : i32
    %c0_i32_0 = arith.constant 0 : i32
    %c0_i32_1 = arith.constant 0 : i32
    return %c0_i32, %c0_i32_0 : i32, i32
  }
  func.func @transform_6(%arg0: i32) -> (i32, i32) {
    %c0_i32 = arith.constant 0 : i32
    %c0_i32_0 = arith.constant 0 : i32
    %c0_i32_1 = arith.constant 0 : i32
    return %c0_i32, %c0_i32_0 : i32, i32
  }
  func.func @transform_7(%arg0: i32) -> (i32, i32) {
    %c0_i32 = arith.constant 0 : i32
    %c0_i32_0 = arith.constant 0 : i32
    return %arg0, %c0_i32 : i32, i32
  }
}

</mosaic_0001>

<bundles_post_ra>
// kernel: tpu_custom_call.1
= control target key start
LH: loop header
LB: loop body
LE: loop exit
PB: predicated region body
PF: predicated region fallthrough
CT: control target
= control target key end

     0   :  { %12 = vsyncpa [#allocation3], 0  ;;  %s1243_s0 = inlined_call_operand.vmem [shape: f32[64,32], index: 0, kind: input, shape index: {}]   ;;  %s1244_s1 = inlined_call_operand.vmem [shape: bf16[32,256], index: 1, kind: input, shape index: {}]   ;;  %s1245_s2 = inlined_call_operand.vmem [shape: f32[1,256], index: 2, kind: input, shape index: {}]   ;;  %s1246_s3 = inlined_call_operand.hbm [shape: bf16[256,256], index: 3, kind: input, shape index: {}]   ;;  %s1247_s4 = inlined_call_operand.vmem [shape: f32[1,256], index: 4, kind: input, shape index: {}]   ;;  %s1248_s5 = inlined_call_operand.hbm [shape: bf16[256,128], index: 5, kind: input, shape index: {}]   ;;  %s1249_s6 = inlined_call_operand.vmem [shape: f32[1,128], index: 6, kind: input, shape index: {}]   ;;  %s1250_s7 = inlined_call_operand.hbm [shape: f32[64,128], index: 7, kind: output, shape index: {}]  }
   0x1   :  { %13 = vsyncpa [#allocation6], 0 }
   0x2   :  { %14 = vsyncpa [#allocation4], 0  ;;  %s1092_s24 = smov [#allocation2]   ;;  %s1020_s28 = scalar_lea.hbm %s1246_s3, 4096 }
   0x3   :  { %s26_s25 = sshll.u32 %s1092_s24, 4  ;;  %p1021_p0 = scmp.ne.s32.totalorder %s1246_s3, %s1020_s28  ;;  %s27_s25 = int_to_ptr.vmem [resolvable:$true] %s26_s25 }
   0x4   :  { %p1024_p1 = scmp.lt.u32.totalorder %s1020_s28, %s1246_s3 }
   0x6   :  { %p1026_p2 = pnand %p1024_p1, %p1021_p0 }
   0x8   :  { %1029 = shalt.err (!%p1026_p2)
}
   0x9   :  { %s1030_s10 = scalar_lea.vmem %s27_s25, 4096  ;;  %p1035_p4 = scmp.lt.s32.totalorder %s27_s25, %s27_s25 }
   0xa   :  { %p1031_p3 = scmp.ne.s32.totalorder %s27_s25, %s1030_s10  ;;  %p1036_p5 = scmp.lt.s32.totalorder %s1030_s10, %s1030_s10 }
   0xc   :  { %p1037_p6 = por %p1036_p5, %p1035_p4 }
   0xe   :  { %p1038_p7 = pnand %p1037_p6, %p1031_p3 }
  0x10   :  { %1041 = shalt.err (!%p1038_p7)
}
  0x11   :  { %s1093_s11 = smov 128   ;;  %s1094_s12 = smov 8  }
  0x12   :  { %32 = dma.hbm_to_vmem [thread:$0]  %s1246_s3, 4096, %s27_s25, [#allocation3], %s1093_s11, %s1093_s11, %s1094_s12  }
  0x13   :  { %s1095_s15 = smov [#allocation5]   ;;  %s1042_s19 = scalar_lea.hbm %s1248_s5, 2048 }
  0x14   :  { %s40_s16 = sshll.u32 %s1095_s15, 4  ;;  %p1043_p8 = scmp.ne.s32.totalorder %s1248_s5, %s1042_s19  ;;  %s41_s16 = int_to_ptr.vmem [resolvable:$true] %s40_s16 }
  0x15   :  { %p1046_p9 = scmp.lt.u32.totalorder %s1042_s19, %s1248_s5 }
  0x17   :  { %p1048_p10 = pnand %p1046_p9, %p1043_p8 }
  0x19   :  { %1051 = shalt.err (!%p1048_p10)
}
  0x1a   :  { %s1052_s24 = scalar_lea.vmem %s41_s16, 2048  ;;  %p1057_p12 = scmp.lt.s32.totalorder %s41_s16, %s41_s16 }
  0x1b   :  { %p1053_p11 = scmp.ne.s32.totalorder %s41_s16, %s1052_s24  ;;  %p1058_p13 = scmp.lt.s32.totalorder %s1052_s24, %s1052_s24 }
  0x1d   :  { %p1059_p0 = por %p1058_p13, %p1057_p12 }
  0x1f   :  { %p1060_p1 = pnand %p1059_p0, %p1053_p11 }
  0x21   :  { %1063 = shalt.err (!%p1060_p1)
}
  0x22   :  { %s1096_s3 = smov 64   ;;  %s1097_s25 = smov 4  }
  0x23   :  { %46 = dma.hbm_to_vmem [thread:$0]  %s1248_s5, 2048, %s41_s16, [#allocation6], %s1096_s3, %s1096_s3, %s1097_s25  }
  0x24   :  { %1086 = dma.done.wait [#allocation3], 4096  }
  0x25   :  { %1087 = vsyncadd [#allocation3], 4294963200 }
  0x26   :  { %1088 = dma.done.wait [#allocation6], 2048  }
  0x27   :  { %1089 = vsyncadd [#allocation6], 4294965248  ;;  %v1098_v0 = vmov 0   ;;  %v918_v1 = vld [vmem:[%s1244_s1 + $0x4] ss:$8 sps:$4 sm:$0xff]   ;;  %vm104_vm0 = vcmask 261120   ;;  %v74_v61 = vlaneseq }
  0x28   :  { %149 = vmatprep.mubr.bf16.mxu0 %v1098_v0  ;;  %v920_v2 = vld [vmem:[%s1244_s1] ss:$8 sps:$4 sm:$0xff]   ;;  %117 = vmatprep.subr.bf16.mxu0 %v918_v1  ;;  %v921_v3 = vld [vmem:[%s1244_s1 + $0x14] ss:$8 sps:$4 sm:$0xff]   ;;  %v923_v4 = vld [vmem:[%s1244_s1 + $0x10] ss:$8 sps:$4 sm:$0xff]  }
  0x29   :  { %118 = vmatpush1.bf16.msra.mxu0 %v920_v2  ;;  %v56_v5 = vld [vmem:[%s1243_s0] sm:$0xff]  ;;  %v57_v6 = vld [vmem:[%s1243_s0 + $0x8] sm:$0xff]  ;;  %v927_v10 = vld [vmem:[#allocation2 + $0x14] ss:$8 sps:$4 sm:$0xff]   ;;  %v1207_v62 = vshrl.u32 %v74_v61, 7 }
  0x2a   :  { %119 = vmatprep.subr.bf16.mxu0 %v921_v3  ;;  %v64_v7 = vpack.c.bf16 %v57_v6, %v56_v5  ;;  %v924_v8 = vld [vmem:[#allocation2 + $0x4] ss:$8 sps:$4 sm:$0xff]   ;;  %v926_v9 = vld [vmem:[#allocation2] ss:$8 sps:$4 sm:$0xff]   ;;  %v929_v11 = vld [vmem:[#allocation2 + $0x10] ss:$8 sps:$4 sm:$0xff]  }
  0x2b   :  { %418 = vmatprep.subr.bf16.mxu1 %v924_v8  ;;  %v930_v12 = vld [vmem:[#allocation2 + $0x24] ss:$8 sps:$4 sm:$0xff]   ;;  %v58_v13 = vld [vmem:[%s1243_s0 + $0x10] sm:$0xff]  ;;  %v59_v14 = vld [vmem:[%s1243_s0 + $0x18] sm:$0xff]  ;;  %v76_v63 = vsub.s32 0, %v1207_v62  ;;  %v80_v1 = vsub.s32 1, %v1207_v62 }
  0x2c   :  { %419 = vmatpush1.bf16.msra.mxu1 %v926_v9  ;;  %v932_v15 = vld [vmem:[#allocation2 + $0x20] ss:$8 sps:$4 sm:$0xff]   ;;  %v65_v16 = vpack.c.bf16 %v59_v14, %v58_v13  ;;  %v933_v17 = vld [vmem:[#allocation2 + $0x34] ss:$8 sps:$4 sm:$0xff]   ;;  %v935_v18 = vld [vmem:[#allocation2 + $0x30] ss:$8 sps:$4 sm:$0xff]  }
  0x2d   :  { %120 = vmatpush1.bf16.msra.mxu0 %v923_v4  ;;  %420 = vmatprep.subr.bf16.mxu1 %v927_v10  ;;  %v936_v19 = vld [vmem:[#allocation2 + $0x44] ss:$8 sps:$4 sm:$0xff]   ;;  %v938_v22 = vld [vmem:[#allocation2 + $0x40] ss:$8 sps:$4 sm:$0xff]   ;;  %v939_v24 = vld [vmem:[#allocation2 + $0x54] ss:$8 sps:$4 sm:$0xff]  }
  0x2e   :  { %v60_v20 = vld [vmem:[%s1243_s0 + $0x20] sm:$0xff]  ;;  %v61_v21 = vld [vmem:[%s1243_s0 + $0x28] sm:$0xff]  ;;  %v941_v25 = vld [vmem:[#allocation2 + $0x50] ss:$8 sps:$4 sm:$0xff]  }
  0x2f   :  { %v66_v23 = vpack.c.bf16 %v61_v21, %v60_v20  ;;  %v942_v26 = vld [vmem:[#allocation2 + $0x64] ss:$8 sps:$4 sm:$0xff]   ;;  %v62_v27 = vld [vmem:[%s1243_s0 + $0x30] sm:$0xff]  ;;  %v63_v28 = vld [vmem:[%s1243_s0 + $0x38] sm:$0xff] }
  0x30   :  { %817 = vmatmul.mubr.msk.bf16.vlgmr.msra.gmra.mrb[0].mxu0 %vm104_vm0, %v64_v7  ;;  %421 = vmatpush1.bf16.msra.mxu1 %v929_v11  ;;  %v944_v29 = vld [vmem:[#allocation2 + $0x60] ss:$8 sps:$4 sm:$0xff]   ;;  %v945_v30 = vld [vmem:[#allocation2 + $0x74] ss:$8 sps:$4 sm:$0xff]   ;;  %v67_v31 = vpack.c.bf16 %v63_v28, %v62_v27  ;;  %v947_v32 = vld [vmem:[#allocation2 + $0x70] ss:$8 sps:$4 sm:$0xff]  }
  0x31   :  { %159 = vmatprep.mubr.bf16.mxu0 %v1098_v0  ;;  %422 = vmatprep.subr.bf16.mxu1 %v930_v12  ;;  %v948_v33 = vld [vmem:[#allocation2 + $0x84] ss:$8 sps:$4 sm:$0xff]   ;;  %v950_v34 = vld [vmem:[#allocation2 + $0x80] ss:$8 sps:$4 sm:$0xff]   ;;  %v951_v35 = vld [vmem:[#allocation2 + $0x94] ss:$8 sps:$4 sm:$0xff]  }
  0x32   :  { %v953_v36 = vld [vmem:[#allocation2 + $0x90] ss:$8 sps:$4 sm:$0xff]   ;;  %v954_v37 = vld [vmem:[#allocation2 + $0xa4] ss:$8 sps:$4 sm:$0xff]   ;;  %v956_v38 = vld [vmem:[#allocation2 + $0xa0] ss:$8 sps:$4 sm:$0xff]  }
  0x33   :  { %v957_v39 = vld [vmem:[#allocation2 + $0xb4] ss:$8 sps:$4 sm:$0xff]   ;;  %v959_v40 = vld [vmem:[#allocation2 + $0xb0] ss:$8 sps:$4 sm:$0xff]   ;;  %v960_v41 = vld [vmem:[#allocation2 + $0xc4] ss:$8 sps:$4 sm:$0xff]  }
  0x34   :  { %423 = vmatpush1.bf16.msra.mxu1 %v932_v15  ;;  %v962_v42 = vld [vmem:[#allocation2 + $0xc0] ss:$8 sps:$4 sm:$0xff]   ;;  %v963_v43 = vld [vmem:[#allocation2 + $0xd4] ss:$8 sps:$4 sm:$0xff]   ;;  %v965_v44 = vld [vmem:[#allocation2 + $0xd0] ss:$8 sps:$4 sm:$0xff]  }
  0x35   :  { %424 = vmatprep.subr.bf16.mxu1 %v933_v17  ;;  %v966_v45 = vld [vmem:[#allocation2 + $0xe4] ss:$8 sps:$4 sm:$0xff]   ;;  %v968_v46 = vld [vmem:[#allocation2 + $0xe0] ss:$8 sps:$4 sm:$0xff]   ;;  %v969_v47 = vld [vmem:[#allocation2 + $0xf4] ss:$8 sps:$4 sm:$0xff]  }
  0x36   :  { %v971_v48 = vld [vmem:[#allocation2 + $0xf0] ss:$8 sps:$4 sm:$0xff]   ;;  %v972_v49 = vld [vmem:[#allocation5 + $0x40] sm:$0xff]   ;;  %v974_v51 = vld [vmem:[#allocation5 + $0x48] sm:$0xff]  }
  0x37   :  { %v973_v50 = vld [vmem:[#allocation5] sm:$0xff]   ;;  %870 = vmatprep.subr.bf16.mxu0 %v972_v49  ;;  %v975_v52 = vld [vmem:[#allocation5 + $0x8] sm:$0xff]   ;;  %v976_v53 = vld [vmem:[#allocation5 + $0x50] sm:$0xff]  }
  0x38   :  { %818 = vmatmul.mubr.msk.bf16.gmra.mrb[4].mxu0 %vm104_vm0, %v65_v16  ;;  %425 = vmatpush1.bf16.msra.mxu1 %v935_v18  ;;  %v977_v54 = vld [vmem:[#allocation5 + $0x10] sm:$0xff]   ;;  %v978_v55 = vld [vmem:[#allocation5 + $0x58] sm:$0xff]   ;;  %v980_v57 = vld [vmem:[#allocation5 + $0x60] sm:$0xff]  }
  0x39   :  { %169 = vmatprep.mubr.bf16.mxu0 %v1098_v0  ;;  %426 = vmatprep.subr.bf16.mxu1 %v936_v19  ;;  %v979_v56 = vld [vmem:[#allocation5 + $0x18] sm:$0xff]   ;;  %v981_v58 = vld [vmem:[#allocation5 + $0x20] sm:$0xff]   ;;  %v982_v59 = vld [vmem:[#allocation5 + $0x68] sm:$0xff]  }
  0x3a   :  { %871 = vmatpush3.bf16.msra.mxu0 %v973_v50  ;;  %v983_v60 = vld [vmem:[#allocation5 + $0x28] sm:$0xff]   ;;  %v985_v61 = vld [vmem:[#allocation5 + $0x30] sm:$0xff]  }
  0x3b   :  { %872 = vmatprep.subr.bf16.mxu0 %v974_v51 }
  0x3c   :  { %427 = vmatpush1.bf16.msra.mxu1 %v938_v22 }
  0x3d   :  { %428 = vmatprep.subr.bf16.mxu1 %v939_v24 }
  0x3e   :  { %873 = vmatpush3.bf16.msra.mxu0 %v975_v52 }
  0x3f   :  { %874 = vmatprep.subr.bf16.mxu0 %v976_v53 }
  0x40   :  { %819 = vmatmul.mubr.msk.bf16.gmra.mrb[8].mxu0 %vm104_vm0, %v66_v23  ;;  %429 = vmatpush1.bf16.msra.mxu1 %v941_v25 }
  0x41   :  { %179 = vmatprep.mubr.bf16.mxu0 %v1098_v0  ;;  %430 = vmatprep.subr.bf16.mxu1 %v942_v26  ;;  %v72_v0 = vld [vmem:[%s1245_s2] sm:$0x3] }
  0x42   :  { %875 = vmatpush3.bf16.msra.mxu0 %v977_v54  ;;  %v77_v2 = vrot.slane %v72_v0, %v76_v63  ;;  %v81_v3 = vrot.slane %v72_v0, %v80_v1  ;;  %v986_v0 = vld [vmem:[#allocation5 + $0x78] sm:$0xff]  }
  0x43   :  { %876 = vmatprep.subr.bf16.mxu0 %v978_v55 }
  0x44   :  { %431 = vmatpush1.bf16.msra.mxu1 %v944_v29 }
  0x45   :  { %432 = vmatprep.subr.bf16.mxu1 %v945_v30 }
  0x46   :  { %877 = vmatpush3.bf16.msra.mxu0 %v979_v56 }
  0x47   :  { %878 = vmatprep.subr.bf16.mxu0 %v980_v57 }
  0x48   :  { %820 = vmatmul.mubr.msk.bf16.gmra.mrb[12].mxu0 %vm104_vm0, %v67_v31  ;;  %433 = vmatpush1.bf16.msra.mxu1 %v947_v32 }
  0x49   :  { %434 = vmatprep.subr.bf16.mxu1 %v948_v33 }
  0x4a   :  { %879 = vmatpush3.bf16.msra.mxu0 %v981_v58 }
  0x4b   :  { %880 = vmatprep.subr.bf16.mxu0 %v982_v59 }
  0x4c   :  { %435 = vmatpush1.bf16.msra.mxu1 %v950_v34 }
  0x4d   :  { %436 = vmatprep.subr.bf16.mxu1 %v951_v35 }
  0x4e   :  { %881 = vmatpush3.bf16.msra.mxu0 %v983_v60  ;;  %v984_v60 = vld [vmem:[#allocation5 + $0x70] sm:$0xff]  }
  0x4f   :  { %882 = vmatprep.subr.bf16.mxu0 %v984_v60 }
  0x50   :  { %437 = vmatpush1.bf16.msra.mxu1 %v953_v36 }
  0x51   :  { %438 = vmatprep.subr.bf16.mxu1 %v954_v37 }
  0x52   :  { %883 = vmatpush3.bf16.msra.mxu0 %v985_v61  ;;  %v853_v61 = vld [vmem:[%s1249_s6] ss:$0 sm:$0xff]  ;;  %s1099_s6 = smov [#allocation7]  }
  0x53   :  { %884 = vmatprep.subr.bf16.mxu0 %v986_v0  ;;  %s800_s8 = sshll.u32 %s1099_s6, 4  ;;  %s801_s8 = int_to_ptr.vmem [resolvable:$true] %s800_s8 }
  0x54   :  { %439 = vmatpush1.bf16.msra.mxu1 %v956_v38  ;;  %s1064_s9 = scalar_lea.vmem %s801_s8, 1024  ;;  %p1069_p3 = scmp.lt.s32.totalorder %s801_s8, %s801_s8 }
  0x55   :  { %440 = vmatprep.subr.bf16.mxu1 %v957_v39  ;;  %p1065_p2 = scmp.ne.s32.totalorder %s801_s8, %s1064_s9  ;;  %p1070_p4 = scmp.lt.s32.totalorder %s1064_s9, %s1064_s9 }
  0x57   :  { %p1071_p5 = por %p1070_p4, %p1069_p3 }
  0x58   :  { %441 = vmatpush1.bf16.msra.mxu1 %v959_v40 }
  0x59   :  { %442 = vmatprep.subr.bf16.mxu1 %v960_v41  ;;  %p1072_p6 = pnand %p1071_p5, %p1065_p2 }
  0x5c   :  { %443 = vmatpush1.bf16.msra.mxu1 %v962_v42 }
  0x5d   :  { %444 = vmatprep.subr.bf16.mxu1 %v963_v43 }
  0x60   :  { %445 = vmatpush1.bf16.msra.mxu1 %v965_v44 }
  0x61   :  { %446 = vmatprep.subr.bf16.mxu1 %v966_v45 }
  0x64   :  { %447 = vmatpush1.bf16.msra.mxu1 %v968_v46 }
  0x65   :  { %448 = vmatprep.subr.bf16.mxu1 %v969_v47 }
  0x68   :  { %449 = vmatpush1.bf16.msra.mxu1 %v971_v48 }
 0x103   :  { %v151_v4 = vpop.f32.mrb[0].mxu0 }
 0x104   :  { %v152_v5 = vadd.f32 %v151_v4, %v77_v2  ;;  %v153_v6 = vpop.f32.mrb[1].mxu0  ;;  %v987_v4 = vld [vmem:[#allocation5 + $0x38] sm:$0xff]  }
 0x105   :  { %v154_v7 = vadd.f32 %v153_v6, %v81_v3  ;;  %v155_v8 = vpop.f32.mrb[2].mxu0  ;;  %885 = vmatpush3.bf16.msra.mxu0 %v987_v4 }
 0x106   :  { %v156_v9 = vadd.f32 %v155_v8, %v77_v2  ;;  %v157_v10 = vpop.f32.mrb[3].mxu0  ;;  %v190_v12 = vmax.f32 %v152_v5, 0.0 }
 0x107   :  { %v158_v11 = vadd.f32 %v157_v10, %v81_v3  ;;  %v191_v14 = vmax.f32 %v154_v7, 0.0 }
 0x108   :  { %v192_v13 = vmax.f32 %v156_v9, 0.0 }
 0x109   :  { %v193_v15 = vmax.f32 %v158_v11, 0.0 }
 0x10a   :  { %v206_v16 = vpack.c.bf16 %v192_v13, %v190_v12 }
 0x10b   :  { %v161_v17 = vpop.f32.mrb[4].mxu0  ;;  %v207_v18 = vpack.c.bf16 %v193_v15, %v191_v14 }
 0x10c   :  { %v162_v19 = vadd.f32 %v161_v17, %v77_v2  ;;  %v163_v20 = vpop.f32.mrb[5].mxu0 }
 0x10d   :  { %v164_v21 = vadd.f32 %v163_v20, %v81_v3  ;;  %v165_v22 = vpop.f32.mrb[6].mxu0  ;;  %450 = vmatprep.mubr.bf16.mxu1 %v207_v18 }
 0x10e   :  { %v166_v23 = vadd.f32 %v165_v22, %v77_v2  ;;  %v167_v24 = vpop.f32.mrb[7].mxu0  ;;  %451 = vmatmul.mubr.bf16.vlgmr.msra.gmra.mrb[0].mxu1 %v206_v16  ;;  %v194_v26 = vmax.f32 %v162_v19, 0.0 }
 0x10f   :  { %v168_v25 = vadd.f32 %v167_v24, %v81_v3  ;;  %v195_v28 = vmax.f32 %v164_v21, 0.0 }
 0x110   :  { %v196_v27 = vmax.f32 %v166_v23, 0.0 }
 0x111   :  { %v197_v29 = vmax.f32 %v168_v25, 0.0 }
 0x112   :  { %v208_v30 = vpack.c.bf16 %v196_v27, %v194_v26 }
 0x113   :  { %v209_v31 = vpack.c.bf16 %v197_v29, %v195_v28  ;;  %v171_v32 = vpop.f32.mrb[8].mxu0 }
 0x114   :  { %v172_v33 = vadd.f32 %v171_v32, %v77_v2  ;;  %v173_v34 = vpop.f32.mrb[9].mxu0 }
 0x115   :  { %v174_v35 = vadd.f32 %v173_v34, %v81_v3  ;;  %v175_v36 = vpop.f32.mrb[10].mxu0  ;;  %460 = vmatprep.mubr.bf16.mxu1 %v209_v31 }
 0x116   :  { %v176_v37 = vadd.f32 %v175_v36, %v77_v2  ;;  %v177_v38 = vpop.f32.mrb[11].mxu0  ;;  %461 = vmatmul.mubr.bf16.gmra.mrb[4].mxu1 %v208_v30  ;;  %v198_v40 = vmax.f32 %v172_v33, 0.0 }
 0x117   :  { %v178_v39 = vadd.f32 %v177_v38, %v81_v3  ;;  %v199_v42 = vmax.f32 %v174_v35, 0.0 }
 0x118   :  { %v200_v41 = vmax.f32 %v176_v37, 0.0 }
 0x119   :  { %v201_v43 = vmax.f32 %v178_v39, 0.0 }
 0x11a   :  { %v210_v44 = vpack.c.bf16 %v200_v41, %v198_v40 }
 0x11b   :  { %v211_v45 = vpack.c.bf16 %v201_v43, %v199_v42  ;;  %v181_v46 = vpop.f32.mrb[12].mxu0 }
 0x11c   :  { %v182_v47 = vadd.f32 %v181_v46, %v77_v2  ;;  %v183_v48 = vpop.f32.mrb[13].mxu0 }
 0x11d   :  { %v184_v49 = vadd.f32 %v183_v48, %v81_v3  ;;  %v185_v50 = vpop.f32.mrb[14].mxu0  ;;  %470 = vmatprep.mubr.bf16.mxu1 %v211_v45 }
 0x11e   :  { %v186_v51 = vadd.f32 %v185_v50, %v77_v2  ;;  %v187_v52 = vpop.f32.mrb[15].mxu0  ;;  %471 = vmatmul.mubr.bf16.gmra.mrb[8].mxu1 %v210_v44  ;;  %v202_v54 = vmax.f32 %v182_v47, 0.0  ;;  %v246_v2 = vld [vmem:[%s1247_s4] sm:$0x3] }
 0x11f   :  { %v188_v53 = vadd.f32 %v187_v52, %v81_v3  ;;  %v203_v56 = vmax.f32 %v184_v49, 0.0  ;;  %v251_v3 = vrot.slane %v246_v2, %v76_v63  ;;  %v255_v5 = vrot.slane %v246_v2, %v80_v1 }
 0x120   :  { %v204_v55 = vmax.f32 %v186_v51, 0.0 }
 0x121   :  { %v205_v57 = vmax.f32 %v188_v53, 0.0 }
 0x122   :  { %v212_v58 = vpack.c.bf16 %v204_v55, %v202_v54 }
 0x123   :  { %v213_v59 = vpack.c.bf16 %v205_v57, %v203_v56 }
 0x125   :  { %480 = vmatprep.mubr.bf16.mxu1 %v213_v59 }
 0x126   :  { %481 = vmatmul.mubr.bf16.gmra.mrb[12].mxu1 %v212_v58 }
 0x1e1   :  { %v452_v6 = vpop.f32.mrb[0].mxu1 }
 0x1e2   :  { %v453_v7 = vadd.f32 %v452_v6, %v251_v3  ;;  %v454_v8 = vpop.f32.mrb[1].mxu1 }
 0x1e3   :  { %v455_v9 = vadd.f32 %v454_v8, %v255_v5  ;;  %v456_v10 = vpop.f32.mrb[2].mxu1 }
 0x1e4   :  { %v457_v11 = vadd.f32 %v456_v10, %v251_v3  ;;  %v458_v12 = vpop.f32.mrb[3].mxu1  ;;  %v491_v14 = vmax.f32 %v453_v7, 0.0 }
 0x1e5   :  { %v459_v13 = vadd.f32 %v458_v12, %v255_v5  ;;  %v492_v16 = vmax.f32 %v455_v9, 0.0 }
 0x1e6   :  { %v493_v15 = vmax.f32 %v457_v11, 0.0 }
 0x1e7   :  { %v494_v17 = vmax.f32 %v459_v13, 0.0 }
 0x1e8   :  { %v507_v18 = vpack.c.bf16 %v493_v15, %v491_v14 }
 0x1e9   :  { %v508_v19 = vpack.c.bf16 %v494_v17, %v492_v16  ;;  %v462_v20 = vpop.f32.mrb[4].mxu1 }
 0x1ea   :  { %v463_v21 = vadd.f32 %v462_v20, %v251_v3  ;;  %v464_v63 = vpop.f32.mrb[5].mxu1 }
 0x1eb   :  { %v465_v22 = vadd.f32 %v464_v63, %v255_v5  ;;  %v466_v62 = vpop.f32.mrb[6].mxu1  ;;  %682 = vmatprep.mubr.bf16.mxu0 %v508_v19 }
 0x1ec   :  { %v467_v1 = vadd.f32 %v466_v62, %v251_v3  ;;  %v468_v23 = vpop.f32.mrb[7].mxu1  ;;  %683 = vmatmul.mubr.bf16.vlgmr.msra.gmra.mrb[16].mxu0 %v507_v18  ;;  %v495_v25 = vmax.f32 %v463_v21, 0.0 }
 0x1ed   :  { %v469_v24 = vadd.f32 %v468_v23, %v255_v5  ;;  %v496_v27 = vmax.f32 %v465_v22, 0.0 }
 0x1ee   :  { %v497_v26 = vmax.f32 %v467_v1, 0.0 }
 0x1ef   :  { %v498_v28 = vmax.f32 %v469_v24, 0.0 }
 0x1f0   :  { %v509_v29 = vpack.c.bf16 %v497_v26, %v495_v25 }
 0x1f1   :  { %v510_v30 = vpack.c.bf16 %v498_v28, %v496_v27  ;;  %v472_v31 = vpop.f32.mrb[8].mxu1 }
 0x1f2   :  { %v473_v32 = vadd.f32 %v472_v31, %v251_v3  ;;  %v474_v33 = vpop.f32.mrb[9].mxu1 }
 0x1f3   :  { %v475_v34 = vadd.f32 %v474_v33, %v255_v5  ;;  %v476_v35 = vpop.f32.mrb[10].mxu1  ;;  %690 = vmatprep.mubr.bf16.mxu0 %v510_v30 }
 0x1f4   :  { %v477_v36 = vadd.f32 %v476_v35, %v251_v3  ;;  %v478_v37 = vpop.f32.mrb[11].mxu1  ;;  %691 = vmatmul.mubr.bf16.gmra.mrb[20].mxu0 %v509_v29  ;;  %v499_v39 = vmax.f32 %v473_v32, 0.0 }
 0x1f5   :  { %v479_v38 = vadd.f32 %v478_v37, %v255_v5  ;;  %v500_v41 = vmax.f32 %v475_v34, 0.0 }
 0x1f6   :  { %v501_v40 = vmax.f32 %v477_v36, 0.0 }
 0x1f7   :  { %v502_v42 = vmax.f32 %v479_v38, 0.0 }
 0x1f8   :  { %v511_v43 = vpack.c.bf16 %v501_v40, %v499_v39 }
 0x1f9   :  { %v512_v44 = vpack.c.bf16 %v502_v42, %v500_v41  ;;  %v482_v45 = vpop.f32.mrb[12].mxu1 }
 0x1fa   :  { %v483_v46 = vadd.f32 %v482_v45, %v251_v3  ;;  %v484_v47 = vpop.f32.mrb[13].mxu1 }
 0x1fb   :  { %v485_v48 = vadd.f32 %v484_v47, %v255_v5  ;;  %v486_v49 = vpop.f32.mrb[14].mxu1  ;;  %698 = vmatprep.mubr.bf16.mxu0 %v512_v44 }
 0x1fc   :  { %v487_v50 = vadd.f32 %v486_v49, %v251_v3  ;;  %v488_v51 = vpop.f32.mrb[15].mxu1  ;;  %699 = vmatmul.mubr.bf16.gmra.mrb[24].mxu0 %v511_v43  ;;  %v503_v53 = vmax.f32 %v483_v46, 0.0 }
 0x1fd   :  { %v489_v52 = vadd.f32 %v488_v51, %v255_v5  ;;  %v504_v55 = vmax.f32 %v485_v48, 0.0 }
 0x1fe   :  { %v505_v54 = vmax.f32 %v487_v50, 0.0 }
 0x1ff   :  { %v506_v56 = vmax.f32 %v489_v52, 0.0 }
 0x200   :  { %v513_v57 = vpack.c.bf16 %v505_v54, %v503_v53 }
 0x201   :  { %v514_v58 = vpack.c.bf16 %v506_v56, %v504_v55 }
 0x203   :  { %706 = vmatprep.mubr.bf16.mxu0 %v514_v58 }
 0x204   :  { %707 = vmatmul.mubr.bf16.gmra.mrb[28].mxu0 %v513_v57 }
 0x2bf   :  { %v886_v59 = vpop.f32.mrb[16].mxu0 }
 0x2c0   :  { %v887_v60 = vpop.f32.mrb[17].mxu0 }
 0x2c1   :  { %v888_v0 = vadd.f32 %v887_v60, %v886_v59  ;;  %v889_v4 = vpop.f32.mrb[18].mxu0 }
 0x2c2   :  { %v890_v2 = vpop.f32.mrb[19].mxu0 }
 0x2c3   :  { %v891_v3 = vadd.f32 %v890_v2, %v889_v4  ;;  %v685_v6 = vadd.f32 %v888_v0, %v853_v61 }
 0x2c5   :  { %715 = vmax.xlane.f32.xlu0 %v685_v6  ;;  %v688_v7 = vadd.f32 %v891_v3, %v853_v61 }
 0x2c7   :  { %v892_v5 = vpop.f32.mrb[20].mxu0 }
 0x2c8   :  { %v893_v8 = vpop.f32.mrb[21].mxu0 }
 0x2c9   :  { %v894_v9 = vadd.f32 %v893_v8, %v892_v5  ;;  %v895_v10 = vpop.f32.mrb[22].mxu0  ;;  %717 = vmax.xlane.f32.xlu0 %v688_v7 }
 0x2ca   :  { %v896_v11 = vpop.f32.mrb[23].mxu0 }
 0x2cb   :  { %v897_v12 = vadd.f32 %v896_v11, %v895_v10  ;;  %v693_v13 = vadd.f32 %v894_v9, %v853_v61 }
 0x2cd   :  { %719 = vmax.xlane.f32.xlu1 %v693_v13  ;;  %v696_v15 = vadd.f32 %v897_v12, %v853_v61 }
 0x2cf   :  { %v898_v14 = vpop.f32.mrb[24].mxu0 }
 0x2d0   :  { %v899_v16 = vpop.f32.mrb[25].mxu0 }
 0x2d1   :  { %v900_v17 = vadd.f32 %v899_v16, %v898_v14  ;;  %v901_v18 = vpop.f32.mrb[26].mxu0  ;;  %721 = vmax.xlane.f32.xlu1 %v696_v15 }
 0x2d2   :  { %v902_v19 = vpop.f32.mrb[27].mxu0 }
 0x2d3   :  { %v903_v20 = vadd.f32 %v902_v19, %v901_v18  ;;  %v701_v21 = vadd.f32 %v900_v17, %v853_v61 }
 0x2d5   :  { %723 = vmax.xlane.f32.xlu0 %v701_v21  ;;  %v704_v63 = vadd.f32 %v903_v20, %v853_v61 }
 0x2d7   :  { %v904_v22 = vpop.f32.mrb[28].mxu0  ;;  %725 = vmax.xlane.f32.xlu1 %v704_v63 }
 0x2d8   :  { %v905_v62 = vpop.f32.mrb[29].mxu0 }
 0x2d9   :  { %v906_v1 = vadd.f32 %v905_v62, %v904_v22  ;;  %v907_v23 = vpop.f32.mrb[30].mxu0 }
 0x2da   :  { %v908_v24 = vpop.f32.mrb[31].mxu0 }
 0x2db   :  { %v909_v25 = vadd.f32 %v908_v24, %v907_v23  ;;  %v709_v26 = vadd.f32 %v906_v1, %v853_v61 }
 0x2dd   :  { %727 = vmax.xlane.f32.xlu0 %v709_v26  ;;  %v712_v27 = vadd.f32 %v909_v25, %v853_v61 }
 0x2df   :  { %729 = vmax.xlane.f32.xlu1 %v712_v27 }
 0x352   :  { %v716_v28 = vpop.xlane.xlu0 %715 }
 0x353   :  { %v731_v29 = vsub.f32 %v685_v6, %v716_v28 }
 0x355   :  { %v739_v30 = vmul.f32 1.442695, %v731_v29 }
 0x356   :  { %v718_v31 = vpop.xlane.xlu0 %717 }
 0x357   :  { %988 = vpow2.f32 %v739_v30  ;;  %v732_v32 = vsub.f32 %v688_v7, %v718_v31 }
 0x359   :  { %v741_v33 = vmul.f32 1.442695, %v732_v32 }
 0x35a   :  { %v720_v34 = vpop.xlane.xlu1 %719 }
 0x35b   :  { %990 = vpow2.f32 %v741_v33  ;;  %v733_v35 = vsub.f32 %v693_v13, %v720_v34 }
 0x35d   :  { %v743_v36 = vmul.f32 1.442695, %v733_v35 }
 0x35e   :  { %v722_v37 = vpop.xlane.xlu1 %721 }
 0x35f   :  { %992 = vpow2.f32 %v743_v36  ;;  %v734_v38 = vsub.f32 %v696_v15, %v722_v37 }
 0x361   :  { %v989_v39 = vpop.eup %988  ;;  %v745_v40 = vmul.f32 1.442695, %v734_v38 }
 0x362   :  { %755 = vadd.xlane.f32.xlu0 %v989_v39  ;;  %v724_v41 = vpop.xlane.xlu0 %723 }
 0x363   :  { %994 = vpow2.f32 %v745_v40  ;;  %v735_v42 = vsub.f32 %v701_v21, %v724_v41 }
 0x364   :  { %v726_v43 = vpop.xlane.xlu1 %725 }
 0x365   :  { %v991_v44 = vpop.eup %990  ;;  %v747_v45 = vmul.f32 1.442695, %v735_v42  ;;  %v736_v46 = vsub.f32 %v704_v63, %v726_v43 }
 0x366   :  { %757 = vadd.xlane.f32.xlu1 %v991_v44 }
 0x367   :  { %996 = vpow2.f32 %v747_v45  ;;  %v749_v47 = vmul.f32 1.442695, %v736_v46 }
 0x369   :  { %v993_v48 = vpop.eup %992  ;;  %998 = vpow2.f32 %v749_v47 }
 0x36a   :  { %759 = vadd.xlane.f32.xlu0 %v993_v48  ;;  %v728_v49 = vpop.xlane.xlu0 %727 }
 0x36b   :  { %v737_v50 = vsub.f32 %v709_v26, %v728_v49 }
 0x36c   :  { %v730_v51 = vpop.xlane.xlu1 %729 }
 0x36d   :  { %v995_v52 = vpop.eup %994  ;;  %v751_v53 = vmul.f32 1.442695, %v737_v50  ;;  %v738_v54 = vsub.f32 %v712_v27, %v730_v51 }
 0x36e   :  { %761 = vadd.xlane.f32.xlu1 %v995_v52 }
 0x36f   :  { %1000 = vpow2.f32 %v751_v53  ;;  %v753_v55 = vmul.f32 1.442695, %v738_v54 }
 0x371   :  { %v997_v56 = vpop.eup %996  ;;  %1002 = vpow2.f32 %v753_v55 }
 0x372   :  { %763 = vadd.xlane.f32.xlu0 %v997_v56 }
 0x373   :  { %v999_v57 = vpop.eup %998 }
 0x374   :  { %765 = vadd.xlane.f32.xlu1 %v999_v57 }
 0x379   :  { %v1001_v58 = vpop.eup %1000 }
 0x37a   :  { %767 = vadd.xlane.f32.xlu0 %v1001_v58 }
 0x37b   :  { %v1003_v59 = vpop.eup %1002 }
 0x37c   :  { %769 = vadd.xlane.f32.xlu1 %v1003_v59 }
 0x3ef   :  { %v756_v60 = vpop.xlane.xlu0 %755 }
 0x3f0   :  { %1004 = vrcp.f32 %v756_v60 }
 0x3f3   :  { %v758_v61 = vpop.xlane.xlu1 %757 }
 0x3f4   :  { %1006 = vrcp.f32 %v758_v61 }
 0x3f7   :  { %v760_v0 = vpop.xlane.xlu0 %759 }
 0x3f8   :  { %1008 = vrcp.f32 %v760_v0 }
 0x3fa   :  { %v1005_v4 = vpop.eup %1004 }
 0x3fb   :  { %v779_v2 = vmul.f32 %v1005_v4, %v989_v39  ;;  %v762_v3 = vpop.xlane.xlu1 %761 }
 0x3fc   :  { %1010 = vrcp.f32 %v762_v3 }
 0x3fd   :  { %787 = vst [vmem:[#allocation7] sm:$0xff] %v779_v2 }
 0x3fe   :  { %v1007_v6 = vpop.eup %1006 }
 0x3ff   :  { %v780_v5 = vmul.f32 %v1007_v6, %v991_v44  ;;  %v764_v7 = vpop.xlane.xlu0 %763 }
 0x400   :  { %1012 = vrcp.f32 %v764_v7 }
 0x401   :  { %788 = vst [vmem:[#allocation7 + $0x8] sm:$0xff] %v780_v5  ;;  %v766_v8 = vpop.xlane.xlu1 %765 }
 0x402   :  { %v1009_v9 = vpop.eup %1008  ;;  %1014 = vrcp.f32 %v766_v8 }
 0x403   :  { %v781_v10 = vmul.f32 %v1009_v9, %v993_v48 }
 0x405   :  { %789 = vst [vmem:[#allocation7 + $0x10] sm:$0xff] %v781_v10 }
 0x406   :  { %v1011_v11 = vpop.eup %1010 }
 0x407   :  { %v782_v12 = vmul.f32 %v1011_v11, %v995_v52  ;;  %v768_v13 = vpop.xlane.xlu0 %767 }
 0x408   :  { %1016 = vrcp.f32 %v768_v13 }
 0x409   :  { %790 = vst [vmem:[#allocation7 + $0x18] sm:$0xff] %v782_v12  ;;  %v770_v14 = vpop.xlane.xlu1 %769 }
 0x40a   :  { %v1013_v15 = vpop.eup %1012  ;;  %1018 = vrcp.f32 %v770_v14 }
 0x40b   :  { %v783_v16 = vmul.f32 %v1013_v15, %v997_v56 }
 0x40c   :  { %v1015_v17 = vpop.eup %1014 }
 0x40d   :  { %791 = vst [vmem:[#allocation7 + $0x20] sm:$0xff] %v783_v16  ;;  %v784_v18 = vmul.f32 %v1015_v17, %v999_v57 }
 0x40f   :  { %792 = vst [vmem:[#allocation7 + $0x28] sm:$0xff] %v784_v18 }
 0x412   :  { %v1017_v19 = vpop.eup %1016 }
 0x413   :  { %v785_v20 = vmul.f32 %v1017_v19, %v1001_v58 }
 0x414   :  { %v1019_v21 = vpop.eup %1018 }
 0x415   :  { %793 = vst [vmem:[#allocation7 + $0x30] sm:$0xff] %v785_v20  ;;  %v786_v63 = vmul.f32 %v1019_v21, %v1003_v59 }
 0x417   :  { %794 = vst [vmem:[#allocation7 + $0x38] sm:$0xff] %v786_v63 }
 0x418   :  { %1075 = shalt.err (!%p1072_p6)
}
 0x419   :  { %s1076_s13 = scalar_lea.hbm %s1250_s7, 1024 }
 0x41a   :  { %p1077_p7 = scmp.ne.s32.totalorder %s1250_s7, %s1076_s13  ;;  %p1080_p8 = scmp.lt.u32.totalorder %s1076_s13, %s1250_s7 }
 0x41c   :  { %p1082_p9 = pnand %p1080_p8, %p1077_p7 }
 0x41e   :  { %1085 = shalt.err (!%p1082_p9)
}
 0x41f   :  { %806 = dma.vmem_to_hbm [thread:$0]  %s801_s8, 1024, %s1250_s7, [#allocation4], %s1093_s11, %s1093_s11, %s1094_s12  }
 0x420   :  { %1090 = dma.done.wait [#allocation4], 1024  }
 0x421   :  { %1091 = vsyncadd [#allocation4], 4294966272 }
 0x422   :  { %810 = vsyncpa [#allocation3], 1 }
 0x423   :  { %811 = vsyncpa [#allocation6], 1 }
 0x424   :  { %812 = vsyncpa [#allocation4], 1 }

</bundles_post_ra>
